<compile_context>
chip_gen: v7x
topology: tpu7x:2x2x1
jax: 0.10.0
libtpu: 0.0.40
codegen_flags: <defaults>
</compile_context>

<pallas_src>
import functools

import jax
import jax.numpy as jnp
from jax.experimental import pallas as pl
from jax.experimental.pallas import tpu as pltpu


def _round_up(x, m):
    return ((x + m - 1) // m) * m


def _pick_tile(dim, candidates):
    """Largest candidate that evenly divides `dim`; else the full dim."""
    for c in candidates:
        if c <= dim and dim % c == 0:
            return c
    return dim


def _head_matmul_kernel(x_ref, w_ref, b_ref, o_ref, acc_ref):
    # x_ref: (bm, bk)   w_ref: (1, bk, Tp)   b_ref: (1, 1, Tp)
    # o_ref: (bm, Tp)   acc_ref: (bm, Tp) f32 scratch
    k = pl.program_id(1)

    @pl.when(k == 0)
    def _init():
        acc_ref[...] = jnp.zeros_like(acc_ref)

    acc_ref[...] += jnp.dot(x_ref[...], w_ref[0],
                            preferred_element_type=jnp.float32)

    @pl.when(k == pl.num_programs(1) - 1)
    def _finalize():
        o_ref[...] = (acc_ref[...] + b_ref[0].astype(jnp.float32)).astype(o_ref.dtype)


@functools.partial(jax.jit, static_argnames=("individual",))
def flatten_head(x, weight, bias, *, individual):
    """FlattenHead forward.

    x      : (B, n_vars, d_model, patch_num)
    weight : (n_w, nf, target_window)  where n_w = n_vars if individual else 1
             (PyTorch Linear weight is (T, nf); this is its transpose, per head)
    bias   : (n_w, target_window)
    returns: (B, n_vars, target_window)
    """
    B, n_vars, d_model, patch_num = x.shape
    nf = d_model * patch_num
    n_w, nf_w, T = weight.shape
    assert nf_w == nf
    assert n_w == (n_vars if individual else 1)

    # Lane-align the output (T) and contraction (nf) dims to 128 with zero padding.
    Tp = _round_up(T, 128)
    nf_p = _round_up(nf, 128)
    if Tp != T or nf_p != nf:
        weight = jnp.pad(weight, ((0, 0), (0, nf_p - nf), (0, Tp - T)))
    if Tp != T:
        bias = jnp.pad(bias, ((0, 0), (0, Tp - T)))
    bias3 = bias.reshape(n_w, 1, Tp)

    # K tile (multiple of 128 by construction since nf_p is).
    bk = _pick_tile(nf_p, (512, 256, 128))
    nk = nf_p // bk

    out_dtype = x.dtype
    itemsize = jnp.dtype(out_dtype).itemsize
    cost = pl.CostEstimate(
        flops=2 * B * n_vars * nf_p * Tp,
        transcendentals=0,
        bytes_accessed=(B * n_vars * nf_p * itemsize
                        + n_w * nf_p * Tp * itemsize
                        + B * n_vars * Tp * itemsize),
    )
    cparams = pltpu.CompilerParams(
        dimension_semantics=("parallel", "arbitrary"))

    if individual:
        # x -> (B, n_vars*nf): variable v's features are a contiguous column block.
        if nf_p != nf:
            x3 = jnp.pad(x.reshape(B, n_vars, nf),
                         ((0, 0), (0, 0), (0, nf_p - nf)))
            x2d = x3.reshape(B, n_vars * nf_p)
        else:
            x2d = x.reshape(B, n_vars * nf_p)

        out2d = pl.pallas_call(
            _head_matmul_kernel,
            out_shape=jax.ShapeDtypeStruct((B, n_vars * Tp), out_dtype),
            grid=(n_vars, nk),
            in_specs=[
                pl.BlockSpec((B, bk), lambda v, k: (0, v * nk + k)),
                pl.BlockSpec((1, bk, Tp), lambda v, k: (v, k, 0)),
                pl.BlockSpec((1, 1, Tp), lambda v, k: (v, 0, 0)),
            ],
            out_specs=pl.BlockSpec((B, Tp), lambda v, k: (0, v)),
            scratch_shapes=[pltpu.VMEM((B, Tp), jnp.float32)],
            compiler_params=cparams,
            cost_estimate=cost,
        )(x2d, weight, bias3)
        out = out2d.reshape(B, n_vars, Tp)
    else:
        # Fold B*n_vars into the matmul M dimension: one big GEMM.
        M = B * n_vars
        x2d = x.reshape(M, nf)
        if nf_p != nf:
            x2d = jnp.pad(x2d, ((0, 0), (0, nf_p - nf)))
        bm = _pick_tile(M, (256, 128, 64, 32, 16, 8))
        nm = M // bm

        out2d = pl.pallas_call(
            _head_matmul_kernel,
            out_shape=jax.ShapeDtypeStruct((M, Tp), out_dtype),
            grid=(nm, nk),
            in_specs=[
                pl.BlockSpec((bm, bk), lambda m, k: (m, k)),
                pl.BlockSpec((1, bk, Tp), lambda m, k: (0, k, 0)),
                pl.BlockSpec((1, 1, Tp), lambda m, k: (0, 0, 0)),
            ],
            out_specs=pl.BlockSpec((bm, Tp), lambda m, k: (m, 0)),
            scratch_shapes=[pltpu.VMEM((bm, Tp), jnp.float32)],
            compiler_params=cparams,
            cost_estimate=cost,
        )(x2d, weight, bias3)
        out = out2d.reshape(B, n_vars, Tp)

    if Tp != T:
        out = out[..., :T]
    return out


def _reference(x, weight, bias, *, individual):
    B, n_vars, d_model, patch_num = x.shape
    nf = d_model * patch_num
    xf = x.reshape(B, n_vars, nf)
    if individual:
        return jnp.einsum("bvn,vnt->bvt", xf, weight) + bias[None, :, :]
    return jnp.einsum("bvn,nt->bvt", xf, weight[0]) + bias[0][None, None, :]


if __name__ == "__main__":
    key = jax.random.PRNGKey(0)

    B, n_vars, d_model, patch_num = 2, 4, 16, 8
    nf = d_model * patch_num          # 128
    target_window = 32

    kx, kw_s, kb_s, kw_i, kb_i = jax.random.split(key, 5)

    x = jax.random.normal(kx, (B, n_vars, d_model, patch_num), dtype=jnp.float32)

    # PyTorch Linear(nf, T) has weight (T, nf); we store the transposed (nf, T) layout.
    w_shared = jax.random.normal(kw_s, (1, nf, target_window), dtype=jnp.float32) * 0.02
    b_shared = jax.random.normal(kb_s, (1, target_window), dtype=jnp.float32) * 0.02

    w_indiv = jax.random.normal(kw_i, (n_vars, nf, target_window), dtype=jnp.float32) * 0.02
    b_indiv = jax.random.normal(kb_i, (n_vars, target_window), dtype=jnp.float32) * 0.02

    # Shared-head path (individual=False)
    y_shared = flatten_head(x, w_shared, b_shared, individual=False)
    jax.block_until_ready(y_shared)
    ref_shared = _reference(x, w_shared, b_shared, individual=False)
    assert y_shared.shape == (B, n_vars, target_window)
    assert jnp.allclose(y_shared, ref_shared, atol=2e-5, rtol=2e-5)

    # Individual-head path (individual=True, one Linear per variable)
    y_indiv = flatten_head(x, w_indiv, b_indiv, individual=True)
    jax.block_until_ready(y_indiv)
    ref_indiv = _reference(x, w_indiv, b_indiv, individual=True)
    assert y_indiv.shape == (B, n_vars, target_window)
    assert jnp.allclose(y_indiv, ref_indiv, atol=2e-5, rtol=2e-5)

    print("KERNEL_OK")
</pallas_src>

<mosaic_0001>
module attributes {stable_mosaic.version = 11 : i64} {
  func.func @_head_matmul_kernel(%arg0: i32, %arg1: i32, %arg2: memref<8x128xf32, #tpu.memory_space<vmem>>, %arg3: memref<1x128x128xf32, #tpu.memory_space<vmem>>, %arg4: memref<1x1x128xf32, #tpu.memory_space<vmem>>, %arg5: memref<8x128xf32, #tpu.memory_space<vmem>>, %arg6: memref<8x128xf32, #tpu.memory_space<vmem>>) attributes {dimension_semantics = [#tpu.dimension_semantics<parallel>, #tpu.dimension_semantics<arbitrary>], iteration_bounds = array<i64: 1, 1>, scalar_prefetch = 0 : i64, scratch_operands = 1 : i64, tpu.core_type = #tpu.core_type<tc>, window_params = [{transform_indices = @transform_0, window_bounds = array<i64: 8, 128>}, {transform_indices = @transform_1, window_bounds = array<i64: 1, 128, 128>}, {pipeline_mode = #tpu.pipeline_mode<synchronous>, transform_indices = @transform_2, window_bounds = array<i64: 1, 1, 128>}, {transform_indices = @transform_3, window_bounds = array<i64: 8, 128>}]} {
    %c0_i32 = arith.constant 0 : i32
    %0 = arith.cmpi eq, %arg1, %c0_i32 : i32
    %1 = arith.extui %0 : i1 to i32
    %c0_i32_0 = arith.constant 0 : i32
    %2 = arith.cmpi ne, %1, %c0_i32_0 : i32
    scf.if %2 {
      %cst_11 = arith.constant 0.000000e+00 : f32
      %13 = vector.broadcast %cst_11 : f32 to vector<8x128xf32>
      %c0_12 = arith.constant 0 : index
      %c0_13 = arith.constant 0 : index
      %14 = vector.load %arg6[%c0_12, %c0_13] : memref<8x128xf32, #tpu.memory_space<vmem>>, vector<8x128xf32>
      tpu.vector_store %arg6[%c0_12, %c0_13], %13 {strides = array<i32>} : memref<8x128xf32, #tpu.memory_space<vmem>>, vector<8x128xf32>,
    } else {
    }
    %c0 = arith.constant 0 : index
    %c0_1 = arith.constant 0 : index
    %3 = vector.load %arg6[%c0, %c0_1] : memref<8x128xf32, #tpu.memory_space<vmem>>, vector<8x128xf32>
    %c0_2 = arith.constant 0 : index
    %c0_3 = arith.constant 0 : index
    %4 = vector.load %arg2[%c0_2, %c0_3] : memref<8x128xf32, #tpu.memory_space<vmem>>, vector<8x128xf32>
    %c0_4 = arith.constant 0 : index
    %c0_5 = arith.constant 0 : index
    %c0_6 = arith.constant 0 : index
    %5 = vector.load %arg3[%c0_4, %c0_5, %c0_6] : memref<1x128x128xf32, #tpu.memory_space<vmem>>, vector<1x128x128xf32>
    %6 = vector.shape_cast %5 : vector<1x128x128xf32> to vector<128x128xf32>
    %cst = arith.constant dense<0.000000e+00> : vector<8x128xf32>
    %7 = tpu.matmul %4, %6, %cst {dimension_numbers = #tpu.dot_dimension_numbers<[1], [0], [0], [1], [0, 0, 1, 1], [], []>} : vector<8x128xf32>, vector<128x128xf32>, vector<8x128xf32> -> vector<8x128xf32>
    %8 = arith.addf %3, %7 : vector<8x128xf32>
    %c0_7 = arith.constant 0 : index
    %c0_8 = arith.constant 0 : index
    %9 = vector.load %arg6[%c0_7, %c0_8] : memref<8x128xf32, #tpu.memory_space<vmem>>, vector<8x128xf32>
    tpu.vector_store %arg6[%c0_7, %c0_8], %8 {strides = array<i32>} : memref<8x128xf32, #tpu.memory_space<vmem>>, vector<8x128xf32>,
    %c0_i32_9 = arith.constant 0 : i32
    %10 = arith.cmpi eq, %arg1, %c0_i32_9 : i32
    %11 = arith.extui %10 : i1 to i32
    %c0_i32_10 = arith.constant 0 : i32
    %12 = arith.cmpi ne, %11, %c0_i32_10 : i32
    scf.if %12 {
      %c0_11 = arith.constant 0 : index
      %c0_12 = arith.constant 0 : index
      %13 = vector.load %arg6[%c0_11, %c0_12] : memref<8x128xf32, #tpu.memory_space<vmem>>, vector<8x128xf32>
      %c0_13 = arith.constant 0 : index
      %c0_14 = arith.constant 0 : index
      %c0_15 = arith.constant 0 : index
      %14 = vector.load %arg4[%c0_13, %c0_14, %c0_15] : memref<1x1x128xf32, #tpu.memory_space<vmem>>, vector<1x1x128xf32>
      %15 = vector.shape_cast %14 : vector<1x1x128xf32> to vector<1x128xf32>
      %16 = vector.broadcast %15 : vector<1x128xf32> to vector<8x128xf32>
      %17 = arith.addf %13, %16 : vector<8x128xf32>
      %c0_16 = arith.constant 0 : index
      %c0_17 = arith.constant 0 : index
      %18 = vector.load %arg5[%c0_16, %c0_17] : memref<8x128xf32, #tpu.memory_space<vmem>>, vector<8x128xf32>
      tpu.vector_store %arg5[%c0_16, %c0_17], %17 {strides = array<i32>} : memref<8x128xf32, #tpu.memory_space<vmem>>, vector<8x128xf32>,
    } else {
    }
    return
  }
  func.func @transform_0(%arg0: i32, %arg1: i32) -> (i32, i32) {
    %c0_i32 = arith.constant 0 : i32
    return %arg0, %arg1 : i32, i32
  }
  func.func @transform_1(%arg0: i32, %arg1: i32) -> (i32, i32, i32) {
    %c0_i32 = arith.constant 0 : i32
    %c0_i32_0 = arith.constant 0 : i32
    %c0_i32_1 = arith.constant 0 : i32
    return %c0_i32, %arg1, %c0_i32_0 : i32, i32, i32
  }
  func.func @transform_2(%arg0: i32, %arg1: i32) -> (i32, i32, i32) {
    %c0_i32 = arith.constant 0 : i32
    %c0_i32_0 = arith.constant 0 : i32
    %c0_i32_1 = arith.constant 0 : i32
    %c0_i32_2 = arith.constant 0 : i32
    return %c0_i32, %c0_i32_0, %c0_i32_1 : i32, i32, i32
  }
  func.func @transform_3(%arg0: i32, %arg1: i32) -> (i32, i32) {
    %c0_i32 = arith.constant 0 : i32
    %c0_i32_0 = arith.constant 0 : i32
    return %arg0, %c0_i32 : i32, i32
  }
}

</mosaic_0001>

<bundles_post_ra>
// kernel: flatten_head.1
= control target key start
LH: loop header
LB: loop body
LE: loop exit
PB: predicated region body
PF: predicated region fallthrough
CT: control target
= control target key end

     0   :  { %v242_v3 = vmov 0.0|0.0   ;;  %vm243_vm0 = vmmov 0   ;;  %v244_v6 = vmov 0.0   ;;  %s332_s0 = inlined_call_operand.vmem [shape: f32[8,128], index: 0, kind: input, shape index: {}]   ;;  %s333_s1 = inlined_call_operand.vmem [shape: f32[1,128,128], index: 1, kind: input, shape index: {}]   ;;  %s334_s2 = inlined_call_operand.vmem [shape: f32[1,1,128], index: 2, kind: input, shape index: {}]   ;;  %s335_s3 = inlined_call_operand.hbm [shape: f32[8,128], index: 3, kind: output, shape index: {}]  }
   0x1   :  { %v22_v0 = vld [vmem:[%s333_s1] sm:$0xff]  ;;  %v23_v1 = vld [vmem:[%s333_s1 + $0x8] sm:$0xff]  ;;  %v24_v2 = vld [vmem:[%s333_s1 + $0x10] sm:$0xff]  ;;  %190 = vmatprep.subr.bf16.mxu0 %v242_v3  ;;  %187 = vmatprep.mubr.msk.f32.mxu0 %vm243_vm0, %v244_v6 }
   0x2   :  { %v191_v4 = vpack.c.bf16 %v23_v1, %v22_v0  ;;  %v25_v5 = vld [vmem:[%s333_s1 + $0x18] sm:$0xff]  ;;  %v26_v8 = vld [vmem:[%s333_s1 + $0x20] sm:$0xff]  ;;  %v27_v9 = vld [vmem:[%s333_s1 + $0x28] sm:$0xff] }
   0x3   :  { %v194_v7 = vpack.c.bf16 %v25_v5, %v24_v2 }
   0x4   :  { %192 = vmatpush3.bf16.msra.mxu0 %v191_v4 }
   0x5   :  { %193 = vmatprep.subr.bf16.mxu0 %v242_v3 }
   0x6   :  { %8 = vsyncpa [#allocation4], 0  ;;  %v197_v10 = vpack.c.bf16 %v27_v9, %v26_v8  ;;  %v28_v11 = vld [vmem:[%s333_s1 + $0x30] sm:$0xff]  ;;  %v29_v12 = vld [vmem:[%s333_s1 + $0x38] sm:$0xff]  ;;  %s245_s21 = smov [#allocation3]  }
   0x7   :  { %v200_v13 = vpack.c.bf16 %v29_v12, %v28_v11  ;;  %v30_v14 = vld [vmem:[%s333_s1 + $0x40] sm:$0xff]  ;;  %v31_v15 = vld [vmem:[%s333_s1 + $0x48] sm:$0xff]  ;;  %v32_v17 = vld [vmem:[%s333_s1 + $0x50] sm:$0xff]  ;;  %s129_s22 = sshll.u32 %s245_s21, 4  ;;  %s130_s22 = int_to_ptr.vmem [resolvable:$true] %s129_s22 }
   0x8   :  { %195 = vmatpush3.bf16.msra.mxu0 %v194_v7  ;;  %v203_v16 = vpack.c.bf16 %v31_v15, %v30_v14  ;;  %v33_v18 = vld [vmem:[%s333_s1 + $0x58] sm:$0xff]  ;;  %v34_v20 = vld [vmem:[%s333_s1 + $0x60] sm:$0xff]  ;;  %v35_v21 = vld [vmem:[%s333_s1 + $0x68] sm:$0xff]  ;;  %p223_p1 = scmp.lt.s32.totalorder %s130_s22, %s130_s22 }
   0x9   :  { %196 = vmatprep.subr.bf16.mxu0 %v242_v3  ;;  %v206_v19 = vpack.c.bf16 %v33_v18, %v32_v17  ;;  %v209_v22 = vpack.c.bf16 %v35_v21, %v34_v20  ;;  %v36_v23 = vld [vmem:[%s333_s1 + $0x70] sm:$0xff]  ;;  %v37_v24 = vld [vmem:[%s333_s1 + $0x78] sm:$0xff]  ;;  %v21_v26 = vld [vmem:[%s332_s0] sm:$0xff]  ;;  %s218_s1 = scalar_lea.vmem %s130_s22, 128 }
   0xa   :  { %v212_v25 = vpack.c.bf16 %v37_v24, %v36_v23  ;;  %v137_v27 = vld [vmem:[%s334_s2] ss:$0 sm:$0xff]  ;;  %p219_p0 = scmp.ne.s32.totalorder %s130_s22, %s218_s1  ;;  %p224_p2 = scmp.lt.s32.totalorder %s218_s1, %s218_s1 }
   0xc   :  { %198 = vmatpush3.bf16.msra.mxu0 %v197_v10  ;;  %p225_p3 = por %p224_p2, %p223_p1 }
   0xd   :  { %199 = vmatprep.subr.bf16.mxu0 %v242_v3 }
   0xe   :  { %p226_p4 = pnand %p225_p3, %p219_p0 }
  0x10   :  { %201 = vmatpush3.bf16.msra.mxu0 %v200_v13 }
  0x11   :  { %202 = vmatprep.subr.bf16.mxu0 %v242_v3 }
  0x14   :  { %204 = vmatpush3.bf16.msra.mxu0 %v203_v16 }
  0x15   :  { %205 = vmatprep.subr.bf16.mxu0 %v242_v3 }
  0x18   :  { %207 = vmatpush3.bf16.msra.mxu0 %v206_v19 }
  0x19   :  { %208 = vmatprep.subr.bf16.mxu0 %v242_v3 }
  0x1c   :  { %210 = vmatpush3.bf16.msra.mxu0 %v209_v22 }
  0x1d   :  { %211 = vmatprep.subr.bf16.mxu0 %v242_v3 }
  0x20   :  { %213 = vmatpush3.bf16.msra.mxu0 %v212_v25 }
  0x23   :  { %188 = vmatmul.mubr.f32.vlgmr.msra.gmra.mrb[0].mxu0 %v21_v26 }
  0xf6   :  { %v104_v28 = vpop.f32.mrb[0].mxu0 }
  0xf7   :  { %v121_v29 = vadd.f32 %v137_v27, %v104_v28  ;;  %v189_v30 = vpop.f32.mrb[1].mxu0 }
  0xf9   :  { %122 = vst [vmem:[#allocation3] sm:$0xff] %v121_v29 }
  0xfa   :  { %229 = shalt.err (!%p226_p4)
}
  0xfb   :  { %s230_s24 = scalar_lea.hbm %s335_s3, 128 }
  0xfc   :  { %p231_p5 = scmp.ne.s32.totalorder %s335_s3, %s230_s24  ;;  %p234_p6 = scmp.lt.u32.totalorder %s230_s24, %s335_s3 }
  0xfe   :  { %p236_p7 = pnand %p234_p6, %p231_p5 }
 0x100   :  { %239 = shalt.err (!%p236_p7)
}
 0x101   :  { %132 = dma.vmem_to_hbm [thread:$0]  %s130_s22, 128, %s335_s3, [#allocation4]  }
 0x102   :  { %240 = dma.done.wait [#allocation4], 128  }
 0x103   :  { %241 = vsyncadd [#allocation4], 4294967168 }
 0x104   :  { %136 = vsyncpa [#allocation4], 1 }

</bundles_post_ra>
